<compile_context>
chip_gen: v6e
topology: v6e:2x2x1
jax: 0.10.0
libtpu: 0.0.40
codegen_flags: <defaults>
</compile_context>

<pallas_src>
import functools

import jax
import jax.numpy as jnp
from jax.experimental import pallas as pl
from jax.experimental.pallas import tpu as pltpu


def encoder_kernel(tok_ref, ptab_ref, whh_ref, out_ref, *, seq_len, batch):
    """Fused (pre-projected) embedding gather + tanh-RNN recurrence.

    tok_ref  : VMEM (S*B, 1) int32  token ids, time-major (row t*B + b)
    ptab_ref : VMEM (V, H)   f32    embedding @ W_ih^T + (b_ih + b_hh)
    whh_ref  : VMEM (H, H)   f32    W_hh^T
    out_ref  : VMEM (S*B, H) f32    h_t for every (t, b) at row t*B + b
    """
    V, H = ptab_ref.shape
    SB = seq_len * batch

    # --- Phase 1: vectorized gather of pre-projected embedding rows ---------
    # one-hot(SB, V) @ pre_table(V, H); exact 0/1 weights select exact rows,
    # replacing 2*S*B serial scalar reads + masked dynamic stores with one
    # MXU pass.
    vocab_iota = jax.lax.broadcasted_iota(jnp.int32, (SB, V), 1)
    onehot = (tok_ref[...] == vocab_iota).astype(jnp.float32)        # (SB, V)
    pre = jnp.dot(onehot, ptab_ref[...],
                  preferred_element_type=jnp.float32)                # (SB, H)

    # --- Phase 2: recurrence, fully unrolled (S is small & static) ----------
    whh = whh_ref[...]                 # keep W_hh^T live across the time loop
    h = jnp.zeros((batch, H), jnp.float32)
    for t in range(seq_len):
        h = jnp.tanh(pre[t * batch:(t + 1) * batch, :]
                     + jnp.dot(h, whh, preferred_element_type=jnp.float32))
        out_ref[t * batch:(t + 1) * batch, :] = h      # static-offset store


def encoder_pallas_forward(words_input, pre_table, w_hh_t):
    """words_input: (B, S) int32. Returns (output (S,B,H), hid (1,B,H))."""
    B, S = words_input.shape
    V, H = pre_table.shape
    SB = S * B

    # Time-major ids: row t*B + b holds words_input[b, t] (matches the kernel
    # and the (S, B, H) output reshape below).
    tokens_tm = jnp.transpose(words_input).reshape(SB, 1).astype(jnp.int32)

    kernel = functools.partial(encoder_kernel, seq_len=S, batch=B)
    out2d = pl.pallas_call(
        kernel,
        out_shape=jax.ShapeDtypeStruct((SB, H), jnp.float32),
        grid=(1,),                       # single launch; loops live in-kernel
        in_specs=[
            pl.BlockSpec((SB, 1), lambda i: (0, 0)),   # token ids
            pl.BlockSpec((V, H), lambda i: (0, 0)),    # pre-projected table
            pl.BlockSpec((H, H), lambda i: (0, 0)),    # W_hh^T
        ],
        out_specs=pl.BlockSpec((SB, H), lambda i: (0, 0)),
        compiler_params=pltpu.CompilerParams(
            dimension_semantics=("arbitrary",)),
    )(tokens_tm, pre_table, w_hh_t)

    output = out2d.reshape(S, B, H)
    # Single-layer unidirectional nn.RNN: final hidden == last timestep output.
    hid = output[-1][None]
    return output, hid


class EncoderPallas:
    """JAX/Pallas port of the PyTorch Encoder (Embedding + nn.RNN, tanh)."""

    def __init__(self, output_dim, emb_dim, hid_dim, key):
        self.output_dim = output_dim
        self.emb_dim = emb_dim
        self.hid_dim = hid_dim

        k_emb, k_wih, k_whh, k_bih, k_bhh = jax.random.split(key, 5)
        self.embedding = jax.random.normal(k_emb, (output_dim, emb_dim),
                                           jnp.float32)
        bound = 1.0 / (hid_dim ** 0.5)
        self.w_ih = jax.random.uniform(k_wih, (hid_dim, emb_dim), jnp.float32,
                                       -bound, bound)
        self.w_hh = jax.random.uniform(k_whh, (hid_dim, hid_dim), jnp.float32,
                                       -bound, bound)
        self.b_ih = jax.random.uniform(k_bih, (hid_dim,), jnp.float32,
                                       -bound, bound)
        self.b_hh = jax.random.uniform(k_bhh, (hid_dim,), jnp.float32,
                                       -bound, bound)

        # One-time algebraic folding: the non-recurrent projection of every
        # possible token, so the kernel only gathers + runs the recurrence.
        #   pre_table[v] = embedding[v] @ W_ih^T + (b_ih + b_hh)     # (V, H)
        self.pre_table = (self.embedding @ self.w_ih.T
                          + (self.b_ih + self.b_hh))
        self.w_hh_t = self.w_hh.T                                    # (H, H)

    def __call__(self, words_input):
        # words_input: int32 (batch, seq_len). Gather + RNN run in one Pallas
        # kernel launch.
        return encoder_pallas_forward(words_input, self.pre_table,
                                      self.w_hh_t)

    # Pure-JAX reference for validation (mirrors PyTorch nn.RNN semantics).
    def reference(self, words_input):
        embeded = jnp.take(self.embedding, words_input, axis=0)
        embeded = jnp.transpose(embeded, (1, 0, 2))        # (S, B, E)
        B = embeded.shape[1]
        h0 = jnp.zeros((B, self.hid_dim), jnp.float32)

        def step(h, x_t):
            h_new = jnp.tanh(x_t @ self.w_ih.T + self.b_ih
                             + h @ self.w_hh.T + self.b_hh)
            return h_new, h_new

        h_last, outs = jax.lax.scan(step, h0, embeded)
        return outs, h_last[None]


if __name__ == "__main__":
    key = jax.random.PRNGKey(0)
    k_params, k_input = jax.random.split(key)

    output_dim = 50   # vocab size
    emb_dim = 16
    hid_dim = 32
    batch = 2
    seq_len = 8

    enc = EncoderPallas(output_dim, emb_dim, hid_dim, k_params)

    words_input = jax.random.randint(k_input, (batch, seq_len), 0, output_dim,
                                     dtype=jnp.int32)

    out, hid = enc(words_input)
    out = jax.block_until_ready(out)
    hid = jax.block_until_ready(hid)

    ref_out, ref_hid = enc.reference(words_input)

    assert out.shape == (seq_len, batch, hid_dim)
    assert hid.shape == (1, batch, hid_dim)
    assert jnp.allclose(out, ref_out, atol=1e-5, rtol=1e-5)
    assert jnp.allclose(hid, ref_hid, atol=1e-5, rtol=1e-5)

    print("KERNEL_OK")
</pallas_src>

<mosaic_0001>
module attributes {stable_mosaic.version = 11 : i64} {
  func.func @encoder_kernel(%arg0: i32, %arg1: memref<16x1xi32, #tpu.memory_space<vmem>>, %arg2: memref<50x32xf32, #tpu.memory_space<vmem>>, %arg3: memref<32x32xf32, #tpu.memory_space<vmem>>, %arg4: memref<16x32xf32, #tpu.memory_space<vmem>>) attributes {dimension_semantics = [#tpu.dimension_semantics<arbitrary>], iteration_bounds = array<i64: 1>, scalar_prefetch = 0 : i64, scratch_operands = 0 : i64, tpu.core_type = #tpu.core_type<tc>, window_params = [{pipeline_mode = #tpu.pipeline_mode<synchronous>, transform_indices = @transform_0, window_bounds = array<i64: 16, 1>}, {pipeline_mode = #tpu.pipeline_mode<synchronous>, transform_indices = @transform_1, window_bounds = array<i64: 50, 32>}, {pipeline_mode = #tpu.pipeline_mode<synchronous>, transform_indices = @transform_2, window_bounds = array<i64: 32, 32>}, {pipeline_mode = #tpu.pipeline_mode<synchronous>, transform_indices = @transform_3, window_bounds = array<i64: 16, 32>}]} {
    %0 = tpu.iota {dimensions = array<i32: 1>} : vector<16x50xi32>
    %c0 = arith.constant 0 : index
    %c0_0 = arith.constant 0 : index
    %1 = vector.load %arg1[%c0, %c0_0] : memref<16x1xi32, #tpu.memory_space<vmem>>, vector<16x1xi32>
    %2 = vector.broadcast %1 : vector<16x1xi32> to vector<16x50xi32>
    %3 = arith.cmpi eq, %2, %0 : vector<16x50xi32>
    %4 = arith.extui %3 : vector<16x50xi1> to vector<16x50xi32>
    %5 = arith.sitofp %4 : vector<16x50xi32> to vector<16x50xf32>
    %c0_1 = arith.constant 0 : index
    %c0_2 = arith.constant 0 : index
    %6 = vector.load %arg2[%c0_1, %c0_2] : memref<50x32xf32, #tpu.memory_space<vmem>>, vector<50x32xf32>
    %cst = arith.constant dense<0.000000e+00> : vector<16x32xf32>
    %7 = tpu.matmul %5, %6, %cst {dimension_numbers = #tpu.dot_dimension_numbers<[1], [0], [0], [1], [0, 0, 1, 1], [], []>} : vector<16x50xf32>, vector<50x32xf32>, vector<16x32xf32> -> vector<16x32xf32>
    %c0_3 = arith.constant 0 : index
    %c0_4 = arith.constant 0 : index
    %8 = vector.load %arg3[%c0_3, %c0_4] : memref<32x32xf32, #tpu.memory_space<vmem>>, vector<32x32xf32>
    %cst_5 = arith.constant 0.000000e+00 : f32
    %9 = vector.broadcast %cst_5 : f32 to vector<2x32xf32>
    %10 = vector.extract_strided_slice %7 {offsets = [0, 0], sizes = [2, 32], strides = [1, 1]} : vector<16x32xf32> to vector<2x32xf32>
    %cst_6 = arith.constant dense<0.000000e+00> : vector<2x32xf32>
    %11 = tpu.matmul %9, %8, %cst_6 {dimension_numbers = #tpu.dot_dimension_numbers<[1], [0], [0], [1], [0, 0, 1, 1], [], []>} : vector<2x32xf32>, vector<32x32xf32>, vector<2x32xf32> -> vector<2x32xf32>
    %12 = arith.addf %10, %11 : vector<2x32xf32>
    %13 = math.tanh %12 : vector<2x32xf32>
    %c0_7 = arith.constant 0 : index
    %c0_8 = arith.constant 0 : index
    %14 = vector.load %arg4[%c0_7, %c0_8] : memref<16x32xf32, #tpu.memory_space<vmem>>, vector<2x32xf32>
    tpu.vector_store %arg4[%c0_7, %c0_8], %13 {strides = array<i32>} : memref<16x32xf32, #tpu.memory_space<vmem>>, vector<2x32xf32>,
    %15 = vector.extract_strided_slice %7 {offsets = [2, 0], sizes = [2, 32], strides = [1, 1]} : vector<16x32xf32> to vector<2x32xf32>
    %cst_9 = arith.constant dense<0.000000e+00> : vector<2x32xf32>
    %16 = tpu.matmul %13, %8, %cst_9 {dimension_numbers = #tpu.dot_dimension_numbers<[1], [0], [0], [1], [0, 0, 1, 1], [], []>} : vector<2x32xf32>, vector<32x32xf32>, vector<2x32xf32> -> vector<2x32xf32>
    %17 = arith.addf %15, %16 : vector<2x32xf32>
    %18 = math.tanh %17 : vector<2x32xf32>
    %c2 = arith.constant 2 : index
    %c0_10 = arith.constant 0 : index
    %19 = vector.load %arg4[%c2, %c0_10] : memref<16x32xf32, #tpu.memory_space<vmem>>, vector<2x32xf32>
    tpu.vector_store %arg4[%c2, %c0_10], %18 {strides = array<i32>} : memref<16x32xf32, #tpu.memory_space<vmem>>, vector<2x32xf32>,
    %20 = vector.extract_strided_slice %7 {offsets = [4, 0], sizes = [2, 32], strides = [1, 1]} : vector<16x32xf32> to vector<2x32xf32>
    %cst_11 = arith.constant dense<0.000000e+00> : vector<2x32xf32>
    %21 = tpu.matmul %18, %8, %cst_11 {dimension_numbers = #tpu.dot_dimension_numbers<[1], [0], [0], [1], [0, 0, 1, 1], [], []>} : vector<2x32xf32>, vector<32x32xf32>, vector<2x32xf32> -> vector<2x32xf32>
    %22 = arith.addf %20, %21 : vector<2x32xf32>
    %23 = math.tanh %22 : vector<2x32xf32>
    %c4 = arith.constant 4 : index
    %c0_12 = arith.constant 0 : index
    %24 = vector.load %arg4[%c4, %c0_12] : memref<16x32xf32, #tpu.memory_space<vmem>>, vector<2x32xf32>
    tpu.vector_store %arg4[%c4, %c0_12], %23 {strides = array<i32>} : memref<16x32xf32, #tpu.memory_space<vmem>>, vector<2x32xf32>,
    %25 = vector.extract_strided_slice %7 {offsets = [6, 0], sizes = [2, 32], strides = [1, 1]} : vector<16x32xf32> to vector<2x32xf32>
    %cst_13 = arith.constant dense<0.000000e+00> : vector<2x32xf32>
    %26 = tpu.matmul %23, %8, %cst_13 {dimension_numbers = #tpu.dot_dimension_numbers<[1], [0], [0], [1], [0, 0, 1, 1], [], []>} : vector<2x32xf32>, vector<32x32xf32>, vector<2x32xf32> -> vector<2x32xf32>
    %27 = arith.addf %25, %26 : vector<2x32xf32>
    %28 = math.tanh %27 : vector<2x32xf32>
    %c6 = arith.constant 6 : index
    %c0_14 = arith.constant 0 : index
    %29 = vector.load %arg4[%c6, %c0_14] : memref<16x32xf32, #tpu.memory_space<vmem>>, vector<2x32xf32>
    tpu.vector_store %arg4[%c6, %c0_14], %28 {strides = array<i32>} : memref<16x32xf32, #tpu.memory_space<vmem>>, vector<2x32xf32>,
    %30 = vector.extract_strided_slice %7 {offsets = [8, 0], sizes = [2, 32], strides = [1, 1]} : vector<16x32xf32> to vector<2x32xf32>
    %cst_15 = arith.constant dense<0.000000e+00> : vector<2x32xf32>
    %31 = tpu.matmul %28, %8, %cst_15 {dimension_numbers = #tpu.dot_dimension_numbers<[1], [0], [0], [1], [0, 0, 1, 1], [], []>} : vector<2x32xf32>, vector<32x32xf32>, vector<2x32xf32> -> vector<2x32xf32>
    %32 = arith.addf %30, %31 : vector<2x32xf32>
    %33 = math.tanh %32 : vector<2x32xf32>
    %c8 = arith.constant 8 : index
    %c0_16 = arith.constant 0 : index
    %34 = vector.load %arg4[%c8, %c0_16] : memref<16x32xf32, #tpu.memory_space<vmem>>, vector<2x32xf32>
    tpu.vector_store %arg4[%c8, %c0_16], %33 {strides = array<i32>} : memref<16x32xf32, #tpu.memory_space<vmem>>, vector<2x32xf32>,
    %35 = vector.extract_strided_slice %7 {offsets = [10, 0], sizes = [2, 32], strides = [1, 1]} : vector<16x32xf32> to vector<2x32xf32>
    %cst_17 = arith.constant dense<0.000000e+00> : vector<2x32xf32>
    %36 = tpu.matmul %33, %8, %cst_17 {dimension_numbers = #tpu.dot_dimension_numbers<[1], [0], [0], [1], [0, 0, 1, 1], [], []>} : vector<2x32xf32>, vector<32x32xf32>, vector<2x32xf32> -> vector<2x32xf32>
    %37 = arith.addf %35, %36 : vector<2x32xf32>
    %38 = math.tanh %37 : vector<2x32xf32>
    %c10 = arith.constant 10 : index
    %c0_18 = arith.constant 0 : index
    %39 = vector.load %arg4[%c10, %c0_18] : memref<16x32xf32, #tpu.memory_space<vmem>>, vector<2x32xf32>
    tpu.vector_store %arg4[%c10, %c0_18], %38 {strides = array<i32>} : memref<16x32xf32, #tpu.memory_space<vmem>>, vector<2x32xf32>,
    %40 = vector.extract_strided_slice %7 {offsets = [12, 0], sizes = [2, 32], strides = [1, 1]} : vector<16x32xf32> to vector<2x32xf32>
    %cst_19 = arith.constant dense<0.000000e+00> : vector<2x32xf32>
    %41 = tpu.matmul %38, %8, %cst_19 {dimension_numbers = #tpu.dot_dimension_numbers<[1], [0], [0], [1], [0, 0, 1, 1], [], []>} : vector<2x32xf32>, vector<32x32xf32>, vector<2x32xf32> -> vector<2x32xf32>
    %42 = arith.addf %40, %41 : vector<2x32xf32>
    %43 = math.tanh %42 : vector<2x32xf32>
    %c12 = arith.constant 12 : index
    %c0_20 = arith.constant 0 : index
    %44 = vector.load %arg4[%c12, %c0_20] : memref<16x32xf32, #tpu.memory_space<vmem>>, vector<2x32xf32>
    tpu.vector_store %arg4[%c12, %c0_20], %43 {strides = array<i32>} : memref<16x32xf32, #tpu.memory_space<vmem>>, vector<2x32xf32>,
    %45 = vector.extract_strided_slice %7 {offsets = [14, 0], sizes = [2, 32], strides = [1, 1]} : vector<16x32xf32> to vector<2x32xf32>
    %cst_21 = arith.constant dense<0.000000e+00> : vector<2x32xf32>
    %46 = tpu.matmul %43, %8, %cst_21 {dimension_numbers = #tpu.dot_dimension_numbers<[1], [0], [0], [1], [0, 0, 1, 1], [], []>} : vector<2x32xf32>, vector<32x32xf32>, vector<2x32xf32> -> vector<2x32xf32>
    %47 = arith.addf %45, %46 : vector<2x32xf32>
    %48 = math.tanh %47 : vector<2x32xf32>
    %c14 = arith.constant 14 : index
    %c0_22 = arith.constant 0 : index
    %49 = vector.load %arg4[%c14, %c0_22] : memref<16x32xf32, #tpu.memory_space<vmem>>, vector<2x32xf32>
    tpu.vector_store %arg4[%c14, %c0_22], %48 {strides = array<i32>} : memref<16x32xf32, #tpu.memory_space<vmem>>, vector<2x32xf32>,
    return
  }
  func.func @transform_0(%arg0: i32) -> (i32, i32) {
    %c0_i32 = arith.constant 0 : i32
    %c0_i32_0 = arith.constant 0 : i32
    %c0_i32_1 = arith.constant 0 : i32
    return %c0_i32, %c0_i32_0 : i32, i32
  }
  func.func @transform_1(%arg0: i32) -> (i32, i32) {
    %c0_i32 = arith.constant 0 : i32
    %c0_i32_0 = arith.constant 0 : i32
    %c0_i32_1 = arith.constant 0 : i32
    return %c0_i32, %c0_i32_0 : i32, i32
  }
  func.func @transform_2(%arg0: i32) -> (i32, i32) {
    %c0_i32 = arith.constant 0 : i32
    %c0_i32_0 = arith.constant 0 : i32
    %c0_i32_1 = arith.constant 0 : i32
    return %c0_i32, %c0_i32_0 : i32, i32
  }
  func.func @transform_3(%arg0: i32) -> (i32, i32) {
    %c0_i32 = arith.constant 0 : i32
    %c0_i32_0 = arith.constant 0 : i32
    %c0_i32_1 = arith.constant 0 : i32
    return %c0_i32, %c0_i32_0 : i32, i32
  }
}

</mosaic_0001>

<bundles_post_ra>
// kernel: tpu_custom_call.1
= control target key start
LH: loop header
LB: loop body
LE: loop exit
PB: predicated region body
PF: predicated region fallthrough
CT: control target
= control target key end

     0   :  { %vm45_vm0 = vcmask 1041408   ;;  %v991_v2 = vmov 0   ;;  %v992_v7 = vmov 0.0   ;;  %s1171_s0 = inlined_call_operand.vmem [shape: s32[16,1], index: 0, kind: input, shape index: {}]   ;;  %s1172_s1 = inlined_call_operand.vmem [shape: f32[50,32], index: 1, kind: input, shape index: {}]   ;;  %s1173_s2 = inlined_call_operand.vmem [shape: f32[32,32], index: 2, kind: input, shape index: {}]   ;;  %s1174_s3 = inlined_call_operand.hbm [shape: f32[16,32], index: 3, kind: output, shape index: {}]  }
   0x1   :  { %v17_v0 = vld [vmem:[%s1171_s0] sm:$0xff]  ;;  %v37_v1 = vld [vmem:[%s1172_s1 + $0x30] sm:$0x3]  ;;  %952 = vset.pattern.permute.xlu0 %v991_v2  ;;  %v36_v3 = vld [vmem:[%s1172_s1 + $0x28] sm:$0xff]  ;;  %858 = vmatprep.subr.mxu1 %v992_v7 }
   0x2   :  { %841 = vmatprep.subr.msk.mxu0 %vm45_vm0, %v37_v1  ;;  %20 = vperm.xlu0 %952, %v17_v0   ;;  %v35_v4 = vld [vmem:[%s1172_s1 + $0x20] sm:$0xff]  ;;  %v1032_v5 = vld [vmem:[%s1173_s2 + $0x18] sm:$0xff]  ;;  %v18_v6 = vld [vmem:[%s1171_s0 + $0x8] sm:$0xff] }
   0x3   :  { %842 = vmatpush3.msk.msra.mxu0 %vm45_vm0, %v37_v1  ;;  %v34_v8 = vld [vmem:[%s1172_s1 + $0x18] sm:$0xff]  ;;  %859 = vmatpush3.msra.mxu1 %v1032_v5  ;;  %v1045_v9 = vld [vmem:[%s1173_s2 + $0x10] sm:$0xff] }
   0x4   :  { %843 = vmatprep.subr.mxu0 %v36_v3 }
   0x5   :  { %844 = vmatpush3.msra.mxu0 %v36_v3 }
   0x6   :  { %8 = vsyncpa [#allocation3], 0  ;;  %845 = vmatprep.subr.mxu0 %v35_v4  ;;  %860 = vmatprep.subr.mxu1 %v992_v7  ;;  %v33_v10 = vld [vmem:[%s1172_s1 + $0x10] sm:$0xff]  ;;  %v1054_v11 = vld [vmem:[%s1173_s2 + $0x8] sm:$0xff]  ;;  %vm993_vm1 = vmmov 0   ;;  %v15_v15 = vlaneseq  ;;  %vm38_vm2 = vcmask 408576  }
   0x7   :  { %23 = vperm.xlu0 %952, %v18_v6   ;;  %846 = vmatpush3.msra.mxu0 %v35_v4  ;;  %v32_v12 = vld [vmem:[%s1172_s1 + $0x8] sm:$0xff]  ;;  %v1064_v13 = vld [vmem:[%s1173_s2] sm:$0xff]  ;;  %vm128_vm5 = vcmask 261120   ;;  %vm204_vm6 = vcmask 254976   ;;  %vm284_vm7 = vcmask 257026   ;;  %vm365_vm8 = vcmask 259076  }
   0x8   :  { %847 = vmatprep.subr.mxu0 %v34_v8  ;;  %861 = vmatpush3.msra.mxu1 %v1045_v9  ;;  %v31_v14 = vld [vmem:[%s1172_s1] sm:$0xff]  ;;  %v16_v16 = vand.u32 127, %v15_v15  ;;  %vm446_vm9 = vcmask 261126   ;;  %s994_s1 = smov [#allocation2]  }
   0x9   :  { %848 = vmatpush3.msra.mxu0 %v34_v8  ;;  %862 = vmatprep.subr.mxu1 %v992_v7  ;;  %s769_s2 = sshll.u32 %s994_s1, 4  ;;  %s770_s2 = int_to_ptr.vmem [resolvable:$true] %s769_s2 }
   0xa   :  { %849 = vmatprep.subr.mxu0 %v33_v10  ;;  %863 = vmatpush3.msra.mxu1 %v1054_v11  ;;  %s969_s10 = scalar_lea.vmem %s770_s2, 256  ;;  %p974_p1 = scmp.lt.s32.totalorder %s770_s2, %s770_s2 }
   0xb   :  { %850 = vmatpush3.msra.mxu0 %v33_v10  ;;  %864 = vmatprep.subr.mxu1 %v992_v7  ;;  %p970_p0 = scmp.ne.s32.totalorder %s770_s2, %s969_s10  ;;  %p975_p2 = scmp.lt.s32.totalorder %s969_s10, %s969_s10 }
   0xc   :  { %851 = vmatprep.subr.mxu0 %v32_v12  ;;  %865 = vmatpush3.msra.mxu1 %v1064_v13 }
   0xd   :  { %852 = vmatpush3.msra.mxu0 %v32_v12  ;;  %866 = vmatprep.mubr.msk.f32.mxu1 %vm993_vm1, %v992_v7  ;;  %p976_p3 = por %p975_p2, %p974_p1 }
   0xe   :  { %853 = vmatprep.subr.mxu0 %v31_v14  ;;  %867 = vmatmul.mubr.f32.vlgmr.msra.gmra.mxu1 %v992_v7 }
   0xf   :  { %854 = vmatpush3.msra.mxu0 %v31_v14  ;;  %869 = vmatprep.subr.mxu1 %v992_v7  ;;  %p977_p4 = pnand %p976_p3, %p970_p0 }
  0x10   :  { %870 = vmatpush3.msra.mxu1 %v1032_v5  ;;  %877 = vmatprep.mubr.msk.f32.mxu1 %vm993_vm1, %v992_v7 }
  0x11   :  { %871 = vmatprep.subr.mxu1 %v992_v7  ;;  %880 = vmatprep.subr.mxu0 %v992_v7 }
  0x12   :  { %872 = vmatpush3.msra.mxu1 %v1045_v9 }
  0x13   :  { %873 = vmatprep.subr.mxu1 %v992_v7 }
  0x14   :  { %874 = vmatpush3.msra.mxu1 %v1054_v11 }
  0x15   :  { %875 = vmatprep.subr.mxu1 %v992_v7 }
  0x16   :  { %876 = vmatpush3.msra.mxu1 %v1064_v13 }
  0x17   :  { %891 = vmatprep.subr.mxu1 %v992_v7 }
  0x7d   :  { %v21_v17 = vpop.permute.xlu0 %20 }
  0x7e   :  { %vm25_vm3 = vcmp.eq.s32.totalorder %v21_v17, %v16_v16 }
  0x7f   :  { %v780_v18 = vsel %vm25_vm3, 1.0, %v992_v7 }
  0x80   :  { %855 = vmatprep.mubr.msk.f32.mxu0 %vm38_vm2, %v780_v18 }
  0x82   :  { %v24_v19 = vpop.permute.xlu0 %23 }
  0x83   :  { %vm26_vm4 = vcmp.eq.s32.totalorder %v24_v19, %v16_v16 }
  0x84   :  { %v781_v20 = vsel %vm26_vm4, 1.0, %v992_v7 }
  0x85   :  { %856 = vmatmul.mubr.msk.f32.vlgmr.msra.gmra.mxu0 %vm38_vm2, %v781_v20 }
  0x86   :  { %881 = vmatpush3.msra.mxu0 %v1032_v5  ;;  %888 = vmatprep.mubr.msk.f32.mxu0 %vm993_vm1, %v992_v7 }
  0x87   :  { %882 = vmatprep.subr.mxu0 %v992_v7 }
  0x88   :  { %883 = vmatpush3.msra.mxu0 %v1045_v9 }
  0x89   :  { %884 = vmatprep.subr.mxu0 %v992_v7 }
  0x8a   :  { %885 = vmatpush3.msra.mxu0 %v1054_v11 }
  0x8b   :  { %886 = vmatprep.subr.mxu0 %v992_v7 }
  0x8c   :  { %887 = vmatpush3.msra.mxu0 %v1064_v13 }
  0x8d   :  { %902 = vmatprep.subr.mxu0 %v992_v7 }
  0xce   :  { %v198_v21 = vpop.f32.mrf.mxu1 }
  0xd0   :  { %v868_v22 = vpop.f32.mrf.mxu1 }
 0x145   :  { %v1099_v23 = vpop.f32.mrf.mxu0 }
 0x147   :  { %v115_v24 = vpop.f32.mrf.mxu0 }
 0x148   :  { %v202_v25 = vadd.f32 %v198_v21, %v115_v24 }
 0x14a   :  { %953 = vtanh.f32 %v202_v25 }
 0x157   :  { %v954_v26 = vpop.eup %953 }
 0x158   :  { %878 = vmatmul.mubr.msk.f32.vlgmr.msra.gmra.mxu1 %vm128_vm5, %v954_v26  ;;  %205 = vst.msk [vmem:[#allocation2] sm:$0x3] %vm204_vm6, %v954_v26 }
 0x159   :  { %892 = vmatpush3.msra.mxu1 %v1032_v5  ;;  %899 = vmatprep.mubr.msk.f32.mxu1 %vm993_vm1, %v992_v7 }
 0x15a   :  { %893 = vmatprep.subr.mxu1 %v992_v7 }
 0x15b   :  { %894 = vmatpush3.msra.mxu1 %v1045_v9 }
 0x15c   :  { %895 = vmatprep.subr.mxu1 %v992_v7 }
 0x15d   :  { %896 = vmatpush3.msra.mxu1 %v1054_v11 }
 0x15e   :  { %897 = vmatprep.subr.mxu1 %v992_v7 }
 0x15f   :  { %898 = vmatpush3.msra.mxu1 %v1064_v13 }
 0x160   :  { %913 = vmatprep.subr.mxu1 %v992_v7 }
 0x218   :  { %v275_v27 = vpop.f32.mrf.mxu1 }
 0x219   :  { %v280_v28 = vrot.slane %v275_v27, 6 }
 0x21a   :  { %v879_v29 = vpop.f32.mrf.mxu1 }
 0x21b   :  { %v282_v30 = vadd.f32 %v280_v28, %v115_v24 }
 0x21d   :  { %955 = vtanh.f32 %v282_v30 }
 0x22a   :  { %v956_v31 = vpop.eup %955 }
 0x22b   :  { %285 = vst.msk [vmem:[#allocation2] sm:$0xc] %vm284_vm7, %v956_v31  ;;  %v287_v32 = vrot.slane %v956_v31, 2 }
 0x22d   :  { %889 = vmatmul.mubr.msk.f32.vlgmr.msra.gmra.mxu0 %vm128_vm5, %v287_v32 }
 0x22e   :  { %903 = vmatpush3.msra.mxu0 %v1032_v5  ;;  %910 = vmatprep.mubr.msk.f32.mxu0 %vm993_vm1, %v992_v7 }
 0x22f   :  { %904 = vmatprep.subr.mxu0 %v992_v7 }
 0x230   :  { %905 = vmatpush3.msra.mxu0 %v1045_v9 }
 0x231   :  { %906 = vmatprep.subr.mxu0 %v992_v7 }
 0x232   :  { %907 = vmatpush3.msra.mxu0 %v1054_v11 }
 0x233   :  { %908 = vmatprep.subr.mxu0 %v992_v7 }
 0x234   :  { %909 = vmatpush3.msra.mxu0 %v1064_v13 }
 0x235   :  { %924 = vmatprep.subr.mxu0 %v992_v7 }
 0x2ed   :  { %v356_v33 = vpop.f32.mrf.mxu0 }
 0x2ee   :  { %v361_v34 = vrot.slane %v356_v33, 4 }
 0x2ef   :  { %v890_v35 = vpop.f32.mrf.mxu0 }
 0x2f0   :  { %v363_v36 = vadd.f32 %v361_v34, %v115_v24 }
 0x2f2   :  { %957 = vtanh.f32 %v363_v36 }
 0x2ff   :  { %v958_v37 = vpop.eup %957 }
 0x300   :  { %366 = vst.msk [vmem:[#allocation2] sm:$0x30] %vm365_vm8, %v958_v37  ;;  %v368_v38 = vrot.slane %v958_v37, 4 }
 0x302   :  { %900 = vmatmul.mubr.msk.f32.vlgmr.msra.gmra.mxu1 %vm128_vm5, %v368_v38 }
 0x303   :  { %914 = vmatpush3.msra.mxu1 %v1032_v5  ;;  %921 = vmatprep.mubr.msk.f32.mxu1 %vm993_vm1, %v992_v7 }
 0x304   :  { %915 = vmatprep.subr.mxu1 %v992_v7 }
 0x305   :  { %916 = vmatpush3.msra.mxu1 %v1045_v9 }
 0x306   :  { %917 = vmatprep.subr.mxu1 %v992_v7 }
 0x307   :  { %918 = vmatpush3.msra.mxu1 %v1054_v11 }
 0x308   :  { %919 = vmatprep.subr.mxu1 %v992_v7 }
 0x309   :  { %920 = vmatpush3.msra.mxu1 %v1064_v13 }
 0x30a   :  { %935 = vmatprep.subr.mxu1 %v992_v7 }
 0x3c2   :  { %v437_v39 = vpop.f32.mrf.mxu1 }
 0x3c3   :  { %v442_v40 = vrot.slane %v437_v39, 2 }
 0x3c4   :  { %v901_v41 = vpop.f32.mrf.mxu1 }
 0x3c5   :  { %v444_v42 = vadd.f32 %v442_v40, %v115_v24 }
 0x3c7   :  { %959 = vtanh.f32 %v444_v42 }
 0x3d4   :  { %v960_v43 = vpop.eup %959 }
 0x3d5   :  { %447 = vst.msk [vmem:[#allocation2] sm:$0xc0] %vm446_vm9, %v960_v43  ;;  %v449_v44 = vrot.slane %v960_v43, 6 }
 0x3d7   :  { %911 = vmatmul.mubr.msk.f32.vlgmr.msra.gmra.mxu0 %vm128_vm5, %v449_v44 }
 0x3d8   :  { %925 = vmatpush3.msra.mxu0 %v1032_v5  ;;  %932 = vmatprep.mubr.msk.f32.mxu0 %vm993_vm1, %v992_v7 }
 0x3d9   :  { %926 = vmatprep.subr.mxu0 %v992_v7 }
 0x3da   :  { %927 = vmatpush3.msra.mxu0 %v1045_v9 }
 0x3db   :  { %928 = vmatprep.subr.mxu0 %v992_v7 }
 0x3dc   :  { %929 = vmatpush3.msra.mxu0 %v1054_v11 }
 0x3dd   :  { %930 = vmatprep.subr.mxu0 %v992_v7 }
 0x3de   :  { %931 = vmatpush3.msra.mxu0 %v1064_v13 }
 0x497   :  { %v518_v45 = vpop.f32.mrf.mxu0 }
 0x498   :  { %v522_v46 = vadd.f32 %v1099_v23, %v518_v45 }
 0x499   :  { %v912_v47 = vpop.f32.mrf.mxu0 }
 0x49a   :  { %961 = vtanh.f32 %v522_v46 }
 0x4a7   :  { %v962_v48 = vpop.eup %961 }
 0x4a8   :  { %524 = vst.msk [vmem:[#allocation2 + $0x8] sm:$0x3] %vm204_vm6, %v962_v48  ;;  %922 = vmatmul.mubr.msk.f32.vlgmr.msra.gmra.mxu1 %vm128_vm5, %v962_v48 }
 0x4a9   :  { %936 = vmatpush3.msra.mxu1 %v1032_v5  ;;  %943 = vmatprep.mubr.msk.f32.mxu1 %vm993_vm1, %v992_v7 }
 0x4aa   :  { %937 = vmatprep.subr.mxu1 %v992_v7 }
 0x4ab   :  { %938 = vmatpush3.msra.mxu1 %v1045_v9 }
 0x4ac   :  { %939 = vmatprep.subr.mxu1 %v992_v7 }
 0x4ad   :  { %940 = vmatpush3.msra.mxu1 %v1054_v11 }
 0x4ae   :  { %941 = vmatprep.subr.mxu1 %v992_v7 }
 0x4af   :  { %942 = vmatpush3.msra.mxu1 %v1064_v13 }
 0x568   :  { %v594_v49 = vpop.f32.mrf.mxu1 }
 0x569   :  { %v599_v50 = vrot.slane %v594_v49, 6 }
 0x56a   :  { %v923_v51 = vpop.f32.mrf.mxu1 }
 0x56b   :  { %v601_v52 = vadd.f32 %v1099_v23, %v599_v50 }
 0x56d   :  { %963 = vtanh.f32 %v601_v52 }
 0x57a   :  { %v964_v53 = vpop.eup %963 }
 0x57b   :  { %603 = vst.msk [vmem:[#allocation2 + $0x8] sm:$0xc] %vm284_vm7, %v964_v53  ;;  %v605_v54 = vrot.slane %v964_v53, 2 }
 0x57d   :  { %933 = vmatmul.mubr.msk.f32.vlgmr.msra.gmra.mxu0 %vm128_vm5, %v605_v54 }
 0x63d   :  { %v674_v55 = vpop.f32.mrf.mxu0 }
 0x63e   :  { %v679_v56 = vrot.slane %v674_v55, 4 }
 0x63f   :  { %v934_v57 = vpop.f32.mrf.mxu0 }
 0x640   :  { %v681_v58 = vadd.f32 %v1099_v23, %v679_v56 }
 0x642   :  { %965 = vtanh.f32 %v681_v58 }
 0x64f   :  { %v966_v59 = vpop.eup %965 }
 0x650   :  { %683 = vst.msk [vmem:[#allocation2 + $0x8] sm:$0x30] %vm365_vm8, %v966_v59  ;;  %v685_v60 = vrot.slane %v966_v59, 4 }
 0x652   :  { %944 = vmatmul.mubr.msk.f32.vlgmr.msra.gmra.mxu1 %vm128_vm5, %v685_v60 }
 0x712   :  { %v754_v61 = vpop.f32.mrf.mxu1 }
 0x713   :  { %v759_v62 = vrot.slane %v754_v61, 2 }
 0x714   :  { %v945_v63 = vpop.f32.mrf.mxu1 }
 0x715   :  { %v761_v0 = vadd.f32 %v1099_v23, %v759_v62 }
 0x717   :  { %967 = vtanh.f32 %v761_v0 }
 0x724   :  { %v968_v1 = vpop.eup %967 }
 0x725   :  { %763 = vst.msk [vmem:[#allocation2 + $0x8] sm:$0xc0] %vm446_vm9, %v968_v1 }
 0x726   :  { %980 = shalt.err (!%p977_p4)
}
 0x727   :  { %s995_s11 = smov 128   ;;  %s996_s12 = smov 8  }
 0x728   :  { %775 = dma.vmem_to_hbm [thread:$0]  %s770_s2, 256, %s1174_s3, [#allocation3], %s995_s11, %s995_s11, %s996_s12  }
 0x729   :  { %989 = dma.done.wait [#allocation3], 256  }
 0x72a   :  { %990 = vsyncadd [#allocation3], 4294967040 }
 0x72b   :  { %779 = vsyncpa [#allocation3], 1 }

</bundles_post_ra>
